<compile_context>
chip_gen: v7x
topology: tpu7x:2x2x1
jax: 0.10.0
libtpu: 0.0.40
codegen_flags: <defaults>
</compile_context>

<pallas_src>
import jax
import jax.numpy as jnp
from jax import lax
from jax.experimental import pallas as pl
from jax.experimental.pallas import tpu as pltpu

EPS = 1e-5
H1 = 128   # fc1 out features
H2 = 64    # fc2 out features


def _comparator_kernel(x1_ref, x2_ref, w1_ref, w2_ref, slab_ref, out_ref):
    B = x1_ref.shape[0]

    # Packed per-channel parameter slab (8, 128):
    #   row 0: b1   row 1: g1   row 2: beta1
    #   row 3: b2   row 4: g2   row 5: beta2   (first 64 lanes valid)
    #   row 6: wf (final Linear weight, lanes 0:64 -> tower1, 64:128 -> tower2)
    #   row 7: bf at [7, 0]
    slab = slab_ref[...]
    b1 = slab[0:1, :]
    g1 = slab[1:2, :]
    be1 = slab[2:3, :]
    b2 = slab[3:4, :H2]
    g2 = slab[4:5, :H2]
    be2 = slab[5:6, :H2]
    wf1 = slab[6:7, :H2]
    wf2 = slab[6:7, H2:]
    bf = slab[7:8, 0:1]

    # Stack both towers along the batch axis: one matmul per layer (tiny VMEM copy).
    x = jnp.concatenate([x1_ref[...], x2_ref[...]], axis=0)          # (2B, in)

    def bn_relu(h, gamma, beta):
        # Training-mode BatchNorm1d with PER-TOWER batch statistics (biased var).
        f = h.shape[-1]
        h3 = h.reshape(2, B, f)
        mu = jnp.mean(h3, axis=1, keepdims=True)                      # (2,1,F)
        ex2 = jnp.mean(h3 * h3, axis=1, keepdims=True)                # (2,1,F)
        var = ex2 - mu * mu
        hn = (h3 - mu) * lax.rsqrt(var + EPS)
        return jnp.maximum(hn * gamma + beta, 0.0).reshape(2 * B, f)

    h = jnp.dot(x, w1_ref[...], preferred_element_type=jnp.float32) + b1
    h = bn_relu(h, g1, be1)                                           # (2B, 128)
    h = jnp.dot(h, w2_ref[...], preferred_element_type=jnp.float32) + b2
    h = bn_relu(h, g2, be2)                                           # (2B, 64)

    f1 = h[:B, :]
    f2 = h[B:, :]
    # Final Linear(128 -> 1): VPU multiply + lane reduce instead of two N=1 MXU ops.
    logit = (jnp.sum(f1 * wf1, axis=-1, keepdims=True)
             + jnp.sum(f2 * wf2, axis=-1, keepdims=True)
             + bf)                                                    # (B, 1)
    out_ref[...] = pl.reciprocal(1.0 + jnp.exp(-logit))               # sigmoid (exact)


def comparator_forward(x1, x2, params):
    B, in_size = x1.shape
    args = (x1, x2, params["w1"], params["w2"], params["slab"])
    vmem = pl.BlockSpec(memory_space=pltpu.MemorySpace.VMEM)
    cost = pl.CostEstimate(
        flops=2 * (2 * B * in_size * H1 + 2 * B * H1 * H2) + 8 * B * (H1 + H2),
        transcendentals=2 * (H1 + H2) + B,
        bytes_accessed=sum(int(a.size) * a.dtype.itemsize for a in args) + B * 4,
    )
    return pl.pallas_call(
        _comparator_kernel,
        out_shape=jax.ShapeDtypeStruct((B, 1), jnp.float32),
        in_specs=[vmem] * len(args),
        out_specs=vmem,
        cost_estimate=cost,
    )(*args)


def _pad128(v):
    return jnp.pad(v, (0, 128 - v.shape[0]))


def init_params(key, input_size):
    ks = jax.random.split(key, 8)
    # Linear weights stored pre-transposed as (in_features, out_features).
    w1 = jax.random.normal(ks[0], (input_size, H1), jnp.float32) * 0.1
    b1 = jax.random.normal(ks[1], (H1,), jnp.float32) * 0.1
    w2 = jax.random.normal(ks[2], (H1, H2), jnp.float32) * 0.1
    b2 = jax.random.normal(ks[3], (H2,), jnp.float32) * 0.1
    # BatchNorm affine params (non-default values to exercise the broadcast path).
    g1 = 1.0 + 0.1 * jax.random.normal(ks[4], (H1,), jnp.float32)
    beta1 = 0.1 * jax.random.normal(ks[5], (H1,), jnp.float32)
    g2 = 1.0 + 0.1 * jax.random.normal(ks[6], (H2,), jnp.float32)
    beta2 = 0.1 * jax.random.normal(ks[7], (H2,), jnp.float32)
    # Final Linear(128 -> 1) stored as a single 128-lane row + scalar bias.
    kf = jax.random.split(jax.random.fold_in(key, 123), 2)
    wf = jax.random.normal(kf[0], (2 * H2,), jnp.float32) * 0.1
    bf = jax.random.normal(kf[1], (), jnp.float32) * 0.1

    slab = jnp.stack(
        [
            _pad128(b1), _pad128(g1), _pad128(beta1),
            _pad128(b2), _pad128(g2), _pad128(beta2),
            _pad128(wf), _pad128(jnp.full((1,), bf, jnp.float32)),
        ],
        axis=0,
    ).astype(jnp.float32)                                            # (8, 128)

    return {
        "w1": w1, "w2": w2, "slab": slab,
        # unpacked copies for the pure-JAX reference
        "b1": b1, "g1": g1, "beta1": beta1,
        "b2": b2, "g2": g2, "beta2": beta2,
        "wf": wf, "bf": bf,
    }


def reference_forward(x1, x2, p):
    def bn_relu(h, g, b):
        mu = jnp.mean(h, axis=0, keepdims=True)
        var = jnp.mean((h - mu) ** 2, axis=0, keepdims=True)
        return jnp.maximum((h - mu) / jnp.sqrt(var + EPS) * g + b, 0.0)

    def feat(x):
        h = bn_relu(x @ p["w1"] + p["b1"], p["g1"], p["beta1"])
        return bn_relu(h @ p["w2"] + p["b2"], p["g2"], p["beta2"])

    f1, f2 = feat(x1), feat(x2)
    logit = jnp.concatenate([f1, f2], axis=1) @ p["wf"][:, None] + p["bf"]
    return jax.nn.sigmoid(logit)


if __name__ == "__main__":
    B, INPUT_SIZE = 8, 32
    key = jax.random.PRNGKey(0)
    k1, k2, kp = jax.random.split(key, 3)
    x1 = jax.random.normal(k1, (B, INPUT_SIZE), jnp.float32)
    x2 = jax.random.normal(k2, (B, INPUT_SIZE), jnp.float32)
    params = init_params(kp, INPUT_SIZE)

    out = comparator_forward(x1, x2, params)
    out = jax.block_until_ready(out)

    ref = reference_forward(x1, x2, params)
    assert out.shape == (B, 1), out.shape
    assert jnp.allclose(out, ref, atol=2e-5, rtol=2e-5), (out, ref)
    print("KERNEL_OK")
</pallas_src>

<mosaic_0001>
module attributes {stable_mosaic.version = 11 : i64} {
  func.func @_comparator_kernel(%arg0: memref<8x32xf32, #tpu.memory_space<vmem>>, %arg1: memref<8x32xf32, #tpu.memory_space<vmem>>, %arg2: memref<32x128xf32, #tpu.memory_space<vmem>>, %arg3: memref<128x64xf32, #tpu.memory_space<vmem>>, %arg4: memref<8x128xf32, #tpu.memory_space<vmem>>, %arg5: memref<8x1xf32, #tpu.memory_space<vmem>>) attributes {dimension_semantics = [], scalar_prefetch = 0 : i64, scratch_operands = 0 : i64, tpu.core_type = #tpu.core_type<tc>} {
    %c0 = arith.constant 0 : index
    %c0_0 = arith.constant 0 : index
    %0 = vector.load %arg4[%c0, %c0_0] : memref<8x128xf32, #tpu.memory_space<vmem>>, vector<8x128xf32>
    %1 = vector.extract_strided_slice %0 {offsets = [0, 0], sizes = [1, 128], strides = [1, 1]} : vector<8x128xf32> to vector<1x128xf32>
    %2 = vector.extract_strided_slice %0 {offsets = [1, 0], sizes = [1, 128], strides = [1, 1]} : vector<8x128xf32> to vector<1x128xf32>
    %3 = vector.extract_strided_slice %0 {offsets = [2, 0], sizes = [1, 128], strides = [1, 1]} : vector<8x128xf32> to vector<1x128xf32>
    %4 = vector.extract_strided_slice %0 {offsets = [3, 0], sizes = [1, 64], strides = [1, 1]} : vector<8x128xf32> to vector<1x64xf32>
    %5 = vector.extract_strided_slice %0 {offsets = [4, 0], sizes = [1, 64], strides = [1, 1]} : vector<8x128xf32> to vector<1x64xf32>
    %6 = vector.extract_strided_slice %0 {offsets = [5, 0], sizes = [1, 64], strides = [1, 1]} : vector<8x128xf32> to vector<1x64xf32>
    %7 = vector.extract_strided_slice %0 {offsets = [6, 0], sizes = [1, 64], strides = [1, 1]} : vector<8x128xf32> to vector<1x64xf32>
    %8 = vector.extract_strided_slice %0 {offsets = [6, 64], sizes = [1, 64], strides = [1, 1]} : vector<8x128xf32> to vector<1x64xf32>
    %9 = vector.extract_strided_slice %0 {offsets = [7, 0], sizes = [1, 1], strides = [1, 1]} : vector<8x128xf32> to vector<1x1xf32>
    %c0_1 = arith.constant 0 : index
    %c0_2 = arith.constant 0 : index
    %10 = vector.load %arg0[%c0_1, %c0_2] : memref<8x32xf32, #tpu.memory_space<vmem>>, vector<8x32xf32>
    %c0_3 = arith.constant 0 : index
    %c0_4 = arith.constant 0 : index
    %11 = vector.load %arg1[%c0_3, %c0_4] : memref<8x32xf32, #tpu.memory_space<vmem>>, vector<8x32xf32>
    %12 = tpu.concatenate %10, %11 in 0 : vector<8x32xf32>, vector<8x32xf32> -> vector<16x32xf32>
    %c0_5 = arith.constant 0 : index
    %c0_6 = arith.constant 0 : index
    %13 = vector.load %arg2[%c0_5, %c0_6] : memref<32x128xf32, #tpu.memory_space<vmem>>, vector<32x128xf32>
    %cst = arith.constant dense<0.000000e+00> : vector<16x128xf32>
    %14 = tpu.matmul %12, %13, %cst {dimension_numbers = #tpu.dot_dimension_numbers<[1], [0], [0], [1], [0, 0, 1, 1], [], []>} : vector<16x32xf32>, vector<32x128xf32>, vector<16x128xf32> -> vector<16x128xf32>
    %15 = vector.broadcast %1 : vector<1x128xf32> to vector<16x128xf32>
    %16 = arith.addf %14, %15 : vector<16x128xf32>
    %17 = vector.shape_cast %16 : vector<16x128xf32> to vector<2x8x128xf32>
    %cst_7 = arith.constant dense<0.000000e+00> : vector<2x128xf32>
    %18 = vector.multi_reduction <add>, %17, %cst_7 [1] : vector<2x8x128xf32> to vector<2x128xf32>
    %19 = vector.shape_cast %18 : vector<2x128xf32> to vector<2x1x128xf32>
    %cst_8 = arith.constant 8.000000e+00 : f32
    %20 = vector.broadcast %cst_8 : f32 to vector<2x1x128xf32>
    %21 = arith.divf %19, %20 : vector<2x1x128xf32>
    %22 = arith.mulf %17, %17 : vector<2x8x128xf32>
    %cst_9 = arith.constant dense<0.000000e+00> : vector<2x128xf32>
    %23 = vector.multi_reduction <add>, %22, %cst_9 [1] : vector<2x8x128xf32> to vector<2x128xf32>
    %24 = vector.shape_cast %23 : vector<2x128xf32> to vector<2x1x128xf32>
    %cst_10 = arith.constant 8.000000e+00 : f32
    %25 = vector.broadcast %cst_10 : f32 to vector<2x1x128xf32>
    %26 = arith.divf %24, %25 : vector<2x1x128xf32>
    %27 = arith.mulf %21, %21 : vector<2x1x128xf32>
    %28 = arith.subf %26, %27 : vector<2x1x128xf32>
    %29 = vector.broadcast %21 : vector<2x1x128xf32> to vector<2x8x128xf32>
    %30 = arith.subf %17, %29 : vector<2x8x128xf32>
    %cst_11 = arith.constant 9.99999974E-6 : f32
    %31 = vector.broadcast %cst_11 : f32 to vector<2x1x128xf32>
    %32 = arith.addf %28, %31 : vector<2x1x128xf32>
    %33 = math.rsqrt %32 : vector<2x1x128xf32>
    %34 = vector.broadcast %33 : vector<2x1x128xf32> to vector<2x8x128xf32>
    %35 = arith.mulf %30, %34 : vector<2x8x128xf32>
    %36 = vector.shape_cast %2 : vector<1x128xf32> to vector<1x1x128xf32>
    %37 = vector.broadcast %36 : vector<1x1x128xf32> to vector<2x8x128xf32>
    %38 = arith.mulf %35, %37 : vector<2x8x128xf32>
    %39 = vector.shape_cast %3 : vector<1x128xf32> to vector<1x1x128xf32>
    %40 = vector.broadcast %39 : vector<1x1x128xf32> to vector<2x8x128xf32>
    %41 = arith.addf %38, %40 : vector<2x8x128xf32>
    %cst_12 = arith.constant 0.000000e+00 : f32
    %42 = vector.broadcast %cst_12 : f32 to vector<2x8x128xf32>
    %43 = arith.maximumf %41, %42 : vector<2x8x128xf32>
    %44 = vector.shape_cast %43 : vector<2x8x128xf32> to vector<16x128xf32>
    %c0_13 = arith.constant 0 : index
    %c0_14 = arith.constant 0 : index
    %45 = vector.load %arg3[%c0_13, %c0_14] : memref<128x64xf32, #tpu.memory_space<vmem>>, vector<128x64xf32>
    %cst_15 = arith.constant dense<0.000000e+00> : vector<16x64xf32>
    %46 = tpu.matmul %44, %45, %cst_15 {dimension_numbers = #tpu.dot_dimension_numbers<[1], [0], [0], [1], [0, 0, 1, 1], [], []>} : vector<16x128xf32>, vector<128x64xf32>, vector<16x64xf32> -> vector<16x64xf32>
    %47 = vector.broadcast %4 : vector<1x64xf32> to vector<16x64xf32>
    %48 = arith.addf %46, %47 : vector<16x64xf32>
    %49 = vector.shape_cast %48 : vector<16x64xf32> to vector<2x8x64xf32>
    %cst_16 = arith.constant dense<0.000000e+00> : vector<2x64xf32>
    %50 = vector.multi_reduction <add>, %49, %cst_16 [1] : vector<2x8x64xf32> to vector<2x64xf32>
    %51 = vector.shape_cast %50 : vector<2x64xf32> to vector<2x1x64xf32>
    %cst_17 = arith.constant 8.000000e+00 : f32
    %52 = vector.broadcast %cst_17 : f32 to vector<2x1x64xf32>
    %53 = arith.divf %51, %52 : vector<2x1x64xf32>
    %54 = arith.mulf %49, %49 : vector<2x8x64xf32>
    %cst_18 = arith.constant dense<0.000000e+00> : vector<2x64xf32>
    %55 = vector.multi_reduction <add>, %54, %cst_18 [1] : vector<2x8x64xf32> to vector<2x64xf32>
    %56 = vector.shape_cast %55 : vector<2x64xf32> to vector<2x1x64xf32>
    %cst_19 = arith.constant 8.000000e+00 : f32
    %57 = vector.broadcast %cst_19 : f32 to vector<2x1x64xf32>
    %58 = arith.divf %56, %57 : vector<2x1x64xf32>
    %59 = arith.mulf %53, %53 : vector<2x1x64xf32>
    %60 = arith.subf %58, %59 : vector<2x1x64xf32>
    %61 = vector.broadcast %53 : vector<2x1x64xf32> to vector<2x8x64xf32>
    %62 = arith.subf %49, %61 : vector<2x8x64xf32>
    %cst_20 = arith.constant 9.99999974E-6 : f32
    %63 = vector.broadcast %cst_20 : f32 to vector<2x1x64xf32>
    %64 = arith.addf %60, %63 : vector<2x1x64xf32>
    %65 = math.rsqrt %64 : vector<2x1x64xf32>
    %66 = vector.broadcast %65 : vector<2x1x64xf32> to vector<2x8x64xf32>
    %67 = arith.mulf %62, %66 : vector<2x8x64xf32>
    %68 = vector.shape_cast %5 : vector<1x64xf32> to vector<1x1x64xf32>
    %69 = vector.broadcast %68 : vector<1x1x64xf32> to vector<2x8x64xf32>
    %70 = arith.mulf %67, %69 : vector<2x8x64xf32>
    %71 = vector.shape_cast %6 : vector<1x64xf32> to vector<1x1x64xf32>
    %72 = vector.broadcast %71 : vector<1x1x64xf32> to vector<2x8x64xf32>
    %73 = arith.addf %70, %72 : vector<2x8x64xf32>
    %cst_21 = arith.constant 0.000000e+00 : f32
    %74 = vector.broadcast %cst_21 : f32 to vector<2x8x64xf32>
    %75 = arith.maximumf %73, %74 : vector<2x8x64xf32>
    %76 = vector.shape_cast %75 : vector<2x8x64xf32> to vector<16x64xf32>
    %77 = vector.extract_strided_slice %76 {offsets = [0, 0], sizes = [8, 64], strides = [1, 1]} : vector<16x64xf32> to vector<8x64xf32>
    %78 = vector.extract_strided_slice %76 {offsets = [8, 0], sizes = [8, 64], strides = [1, 1]} : vector<16x64xf32> to vector<8x64xf32>
    %79 = vector.broadcast %7 : vector<1x64xf32> to vector<8x64xf32>
    %80 = arith.mulf %77, %79 : vector<8x64xf32>
    %cst_22 = arith.constant dense<0.000000e+00> : vector<8xf32>
    %81 = vector.multi_reduction <add>, %80, %cst_22 [1] : vector<8x64xf32> to vector<8xf32>
    %82 = vector.shape_cast %81 : vector<8xf32> to vector<8x1xf32>
    %83 = vector.broadcast %8 : vector<1x64xf32> to vector<8x64xf32>
    %84 = arith.mulf %78, %83 : vector<8x64xf32>
    %cst_23 = arith.constant dense<0.000000e+00> : vector<8xf32>
    %85 = vector.multi_reduction <add>, %84, %cst_23 [1] : vector<8x64xf32> to vector<8xf32>
    %86 = vector.shape_cast %85 : vector<8xf32> to vector<8x1xf32>
    %87 = arith.addf %82, %86 : vector<8x1xf32>
    %88 = vector.broadcast %9 : vector<1x1xf32> to vector<8x1xf32>
    %89 = arith.addf %87, %88 : vector<8x1xf32>
    %cst_24 = arith.constant 0.000000e+00 : f32
    %90 = vector.broadcast %cst_24 : f32 to vector<8x1xf32>
    %91 = arith.subf %90, %89 : vector<8x1xf32>
    %92 = math.exp %91 : vector<8x1xf32>
    %cst_25 = arith.constant 1.000000e+00 : f32
    %93 = vector.broadcast %cst_25 : f32 to vector<8x1xf32>
    %94 = arith.addf %93, %92 : vector<8x1xf32>
    %95 = tpu.reciprocal %94 : vector<8x1xf32> -> vector<8x1xf32>
    %c0_26 = arith.constant 0 : index
    %c0_27 = arith.constant 0 : index
    %96 = vector.load %arg5[%c0_26, %c0_27] : memref<8x1xf32, #tpu.memory_space<vmem>>, vector<8x1xf32>
    tpu.vector_store %arg5[%c0_26, %c0_27], %95 {strides = array<i32>} : memref<8x1xf32, #tpu.memory_space<vmem>>, vector<8x1xf32>,
    return
  }
}

</mosaic_0001>

<bundles_post_ra>
// kernel: tpu_custom_call.1
= control target key start
LH: loop header
LB: loop body
LE: loop exit
PB: predicated region body
PF: predicated region fallthrough
CT: control target
= control target key end

     0   :  { %vm31_vm0 = vcmask 261120   ;;  %v27_v32 = vlaneseq  ;;  %vm265_vm1 = vcmask 523264   ;;  %vm353_vm2 = vcmask 7168   ;;  %s617_s2 = inlined_call_operand.vmem [shape: f32[32,128], index: 2, kind: input, shape index: {}]   ;;  %s618_s0 = inlined_call_operand.vmem [shape: f32[8,32], index: 0, kind: input, shape index: {}]   ;;  %s619_s1 = inlined_call_operand.vmem [shape: f32[8,32], index: 1, kind: input, shape index: {}]   ;;  %s620_s3 = inlined_call_operand.vmem [shape: f32[128,64], index: 3, kind: input, shape index: {}]   ;;  %s621_s4 = inlined_call_operand.vmem [shape: f32[8,128], index: 4, kind: input, shape index: {}]   ;;  %s622_s5 = inlined_call_operand.vmem [shape: f32[8,1], index: 5, kind: output, shape index: {}]  }
   0x1   :  { %v23_v0 = vld [vmem:[%s617_s2] sm:$0xff]  ;;  %v24_v1 = vld [vmem:[%s617_s2 + $0x8] sm:$0xff]  ;;  %v25_v2 = vld [vmem:[%s617_s2 + $0x10] sm:$0xff] }
   0x2   :  { %v431_v3 = vpack.c.bf16 %v24_v1, %v23_v0  ;;  %v26_v4 = vld [vmem:[%s617_s2 + $0x18] sm:$0xff]  ;;  %v21_v5 = vld [vmem:[%s618_s0] sm:$0xff]  ;;  %v171_v9 = vld [vmem:[%s620_s3 + $0x8] sm:$0xff]  ;;  %v581_v33 = vshrl.u32 %v27_v32, 7 }
   0x3   :  { %v435_v6 = vpack.c.bf16 %v26_v4, %v25_v2  ;;  %393 = vmatprep.mubr.msk.f32.mxu0 %vm31_vm0, %v21_v5  ;;  %v22_v7 = vld [vmem:[%s619_s1] sm:$0xff]  ;;  %v172_v11 = vld [vmem:[%s620_s3 + $0x10] sm:$0xff]  ;;  %v173_v12 = vld [vmem:[%s620_s3 + $0x18] sm:$0xff] }
   0x4   :  { %432 = vmatprep.subr.bf16.mxu0 %v431_v3  ;;  %v170_v8 = vld [vmem:[%s620_s3] sm:$0xff]  ;;  %v443_v13 = vpack.c.bf16 %v173_v12, %v172_v11  ;;  %v175_v15 = vld [vmem:[%s620_s3 + $0x28] sm:$0xff]  ;;  %v176_v17 = vld [vmem:[%s620_s3 + $0x30] sm:$0xff]  ;;  %v328_v34 = vsub.s32 6, %v581_v33  ;;  %v29_v37 = vsub.s32 0, %v581_v33 }
   0x5   :  { %434 = vmatpush3.bf16.msra.mxu0 %v431_v3  ;;  %v439_v10 = vpack.c.bf16 %v171_v9, %v170_v8  ;;  %v174_v14 = vld [vmem:[%s620_s3 + $0x20] sm:$0xff]  ;;  %v177_v18 = vld [vmem:[%s620_s3 + $0x38] sm:$0xff]  ;;  %v179_v21 = vld [vmem:[%s620_s3 + $0x48] sm:$0xff] }
   0x6   :  { %436 = vmatprep.subr.bf16.mxu0 %v435_v6  ;;  %v447_v16 = vpack.c.bf16 %v175_v15, %v174_v14  ;;  %v451_v19 = vpack.c.bf16 %v177_v18, %v176_v17  ;;  %v178_v20 = vld [vmem:[%s620_s3 + $0x40] sm:$0xff]  ;;  %v180_v22 = vld [vmem:[%s620_s3 + $0x50] sm:$0xff]  ;;  %v181_v24 = vld [vmem:[%s620_s3 + $0x58] sm:$0xff]  ;;  %v158_v15 = vsub.s32 1, %v581_v33 }
   0x7   :  { %440 = vmatprep.subr.bf16.mxu1 %v439_v10  ;;  %v455_v23 = vpack.c.bf16 %v179_v21, %v178_v20  ;;  %v459_v25 = vpack.c.bf16 %v181_v24, %v180_v22  ;;  %v182_v26 = vld [vmem:[%s620_s3 + $0x60] sm:$0xff]  ;;  %v183_v27 = vld [vmem:[%s620_s3 + $0x68] sm:$0xff]  ;;  %v184_v29 = vld [vmem:[%s620_s3 + $0x70] sm:$0xff] }
   0x8   :  { %442 = vmatpush3.bf16.msra.mxu1 %v439_v10  ;;  %v463_v28 = vpack.c.bf16 %v183_v27, %v182_v26  ;;  %v185_v30 = vld [vmem:[%s620_s3 + $0x78] sm:$0xff]  ;;  %v587_v35 = vld [vmem:[%s621_s4] sm:$0xff]  ;;  %s484_s3 = smov 64  }
   0x9   :  { %438 = vmatpush3.bf16.msra.mxu0 %v435_v6  ;;  %444 = vmatprep.subr.bf16.mxu1 %v443_v13  ;;  %v467_v31 = vpack.c.bf16 %v185_v30, %v184_v29  ;;  %v590_v36 = vrot.slane %v587_v35, %v328_v34  ;;  %v30_v38 = vrot.slane %v587_v35, %v29_v37 }
   0xa   :  { %v159_v18 = vrot.slane %v587_v35, %v158_v15 }
   0xb   :  { %335 = vrot.lane.b32.xlu0 %v590_v36, %s484_s3 }
   0xc   :  { %394 = vmatmul.mubr.msk.f32.vlgmr.msra.gmra.mrb[0].mxu0 %vm31_vm0, %v22_v7  ;;  %446 = vmatpush3.bf16.msra.mxu1 %v443_v13 }
   0xd   :  { %448 = vmatprep.subr.bf16.mxu1 %v447_v16 }
  0x10   :  { %450 = vmatpush3.bf16.msra.mxu1 %v447_v16  ;;  %v164_v16 = vsub.s32 2, %v581_v33 }
  0x11   :  { %452 = vmatprep.subr.bf16.mxu1 %v451_v19 }
  0x12   :  { %v165_v22 = vrot.slane %v587_v35, %v164_v16  ;;  %v314_v16 = vsub.s32 4, %v581_v33 }
  0x14   :  { %454 = vmatpush3.bf16.msra.mxu1 %v451_v19 }
  0x15   :  { %456 = vmatprep.subr.bf16.mxu1 %v455_v23 }
  0x18   :  { %458 = vmatpush3.bf16.msra.mxu1 %v455_v23 }
  0x19   :  { %460 = vmatprep.subr.bf16.mxu1 %v459_v25 }
  0x1c   :  { %462 = vmatpush3.bf16.msra.mxu1 %v459_v25 }
  0x1d   :  { %464 = vmatprep.subr.bf16.mxu1 %v463_v28 }
  0x20   :  { %466 = vmatpush3.bf16.msra.mxu1 %v463_v28 }
  0x21   :  { %468 = vmatprep.subr.bf16.mxu1 %v467_v31 }
  0x24   :  { %470 = vmatpush3.bf16.msra.mxu1 %v467_v31  ;;  %v188_v31 = vsub.s32 3, %v581_v33 }
  0x26   :  { %v189_v32 = vrot.slane %v587_v35, %v188_v31 }
  0xdf   :  { %v395_v39 = vpop.f32.mrb[0].mxu0 }
  0xe0   :  { %v110_v40 = vadd.f32 %v395_v39, %v30_v38  ;;  %v104_v41 = vpop.f32.mrb[1].mxu0 }
  0xe1   :  { %v105_v42 = vadd.f32 %v104_v41, %v30_v38 }
  0xe2   :  { %v119_v43 = vrot.slane %v110_v40, 4  ;;  %v129_v44 = vmul.f32 %v110_v40, %v110_v40 }
  0xe3   :  { %v113_v45 = vrot.slane %v105_v42, 4  ;;  %v128_v46 = vmul.f32 %v105_v42, %v105_v42 }
  0xe4   :  { %v120_v47 = vadd.f32 %v119_v43, %v110_v40  ;;  %v136_v48 = vrot.slane %v129_v44, 4 }
  0xe5   :  { %v114_v49 = vadd.f32 %v113_v45, %v105_v42  ;;  %v130_v50 = vrot.slane %v128_v46, 4 }
  0xe6   :  { %v121_v51 = vrot.slane %v120_v47, 2  ;;  %v137_v52 = vadd.f32 %v136_v48, %v129_v44 }
  0xe7   :  { %v115_v53 = vrot.slane %v114_v49, 2  ;;  %v131_v54 = vadd.f32 %v130_v50, %v128_v46 }
  0xe8   :  { %v122_v55 = vadd.f32 %v121_v51, %v120_v47  ;;  %v138_v56 = vrot.slane %v137_v52, 2 }
  0xe9   :  { %v116_v57 = vadd.f32 %v115_v53, %v114_v49  ;;  %v132_v58 = vrot.slane %v131_v54, 2 }
  0xea   :  { %v123_v59 = vrot.slane %v122_v55, 1  ;;  %v139_v60 = vadd.f32 %v138_v56, %v137_v52 }
  0xeb   :  { %v133_v61 = vadd.f32 %v132_v58, %v131_v54  ;;  %v117_v62 = vrot.slane %v116_v57, 1 }
  0xec   :  { %v124_v63 = vadd.f32 %v123_v59, %v122_v55  ;;  %v140_v0 = vrot.slane %v139_v60, 1 }
  0xed   :  { %v134_v1 = vrot.slane %v133_v61, 1  ;;  %v118_v2 = vadd.f32 %v117_v62, %v116_v57 }
  0xee   :  { %v127_v3 = vmul.f32 0.125, %v124_v63  ;;  %v141_v4 = vadd.f32 %v140_v0, %v139_v60 }
  0xef   :  { %v135_v5 = vadd.f32 %v134_v1, %v133_v61  ;;  %v126_v6 = vmul.f32 0.125, %v118_v2 }
  0xf0   :  { %v143_v7 = vmul.f32 0.125, %v141_v4  ;;  %v145_v8 = vmul.f32 %v127_v3, %v127_v3  ;;  %v149_v17 = vsub.f32 %v110_v40, %v127_v3 }
  0xf1   :  { %v142_v9 = vmul.f32 0.125, %v135_v5  ;;  %v144_v10 = vmul.f32 %v126_v6, %v126_v6  ;;  %v148_v20 = vsub.f32 %v105_v42, %v126_v6 }
  0xf2   :  { %v147_v11 = vsub.f32 %v143_v7, %v145_v8 }
  0xf3   :  { %v146_v12 = vsub.f32 %v142_v9, %v144_v10 }
  0xf4   :  { %v151_v13 = vadd.f32 1e-05, %v147_v11 }
  0xf5   :  { %v150_v14 = vadd.f32 1e-05, %v146_v12 }
  0xf6   :  { %472 = vrsqrt.f32 %v151_v13 }
  0xf7   :  { %474 = vrsqrt.f32 %v150_v14 }
 0x100   :  { %v473_v19 = vpop.eup %472 }
 0x101   :  { %v475_v21 = vpop.eup %474  ;;  %v155_v23 = vmul.f32 %v473_v19, %v149_v17  ;;  %v320_v17 = vsub.s32 5, %v581_v33  ;;  %v315_v19 = vrot.slane %v587_v35, %v314_v16 }
 0x102   :  { %v154_v24 = vmul.f32 %v475_v21, %v148_v20 }
 0x103   :  { %v161_v25 = vmul.f32 %v159_v18, %v155_v23 }
 0x104   :  { %v160_v26 = vmul.f32 %v159_v18, %v154_v24  ;;  %v321_v24 = vrot.slane %v587_v35, %v320_v17 }
 0x105   :  { %v167_v27 = vadd.f32 %v165_v22, %v161_v25 }
 0x106   :  { %v166_v28 = vadd.f32 %v165_v22, %v160_v26 }
 0x107   :  { %v169_v30 = vmax.f32 %v167_v27, 0.0 }
 0x108   :  { %v168_v29 = vmax.f32 %v166_v28, 0.0 }
 0x10a   :  { %428 = vmatprep.mubr.f32.mxu1 %v168_v29  ;;  %v336_v29 = vpop.permute.xlu0 %335 }
 0x10b   :  { %429 = vmatmul.mubr.f32.vlgmr.msra.gmra.mrb[0].mxu1 %v169_v30 }
 0x1de   :  { %v430_v34 = vpop.f32.mrb[0].mxu1 }
 0x1df   :  { %v262_v37 = vadd.f32 %v430_v34, %v189_v32  ;;  %v256_v38 = vpop.f32.mrb[1].mxu1 }
 0x1e0   :  { %v257_v39 = vadd.f32 %v256_v38, %v189_v32 }
 0x1e1   :  { %v273_v40 = vsel %vm265_vm1, %v262_v37, 0.0  ;;  %v283_v41 = vmul.f32 %v262_v37, %v262_v37 }
 0x1e2   :  { %v274_v42 = vrot.slane %v273_v40, 4  ;;  %v266_v43 = vsel %vm265_vm1, %v257_v39, 0.0  ;;  %v282_v44 = vmul.f32 %v257_v39, %v257_v39 }
 0x1e3   :  { %v291_v45 = vsel %vm265_vm1, %v283_v41, 0.0  ;;  %v267_v46 = vrot.slane %v266_v43, 4 }
 0x1e4   :  { %v275_v47 = vadd.f32 %v274_v42, %v273_v40  ;;  %v292_v48 = vrot.slane %v291_v45, 4  ;;  %v284_v49 = vsel %vm265_vm1, %v282_v44, 0.0  ;;  %v345_v40 = vsub.s32 7, %v581_v33 }
 0x1e5   :  { %v268_v50 = vadd.f32 %v267_v46, %v266_v43  ;;  %v285_v51 = vrot.slane %v284_v49, 4 }
 0x1e6   :  { %v276_v52 = vrot.slane %v275_v47, 2  ;;  %v293_v53 = vadd.f32 %v292_v48, %v291_v45  ;;  %v346_v42 = vrot.slane %v587_v35, %v345_v40 }
 0x1e7   :  { %v269_v54 = vrot.slane %v268_v50, 2  ;;  %v286_v55 = vadd.f32 %v285_v51, %v284_v49 }
 0x1e8   :  { %v277_v56 = vadd.f32 %v276_v52, %v275_v47  ;;  %v294_v57 = vrot.slane %v293_v53, 2 }
 0x1e9   :  { %v270_v58 = vadd.f32 %v269_v54, %v268_v50  ;;  %v287_v59 = vrot.slane %v286_v55, 2 }
 0x1ea   :  { %v278_v60 = vrot.slane %v277_v56, 1  ;;  %v295_v61 = vadd.f32 %v294_v57, %v293_v53 }
 0x1eb   :  { %v271_v62 = vrot.slane %v270_v58, 1  ;;  %v288_v63 = vadd.f32 %v287_v59, %v286_v55 }
 0x1ec   :  { %v279_v0 = vadd.f32 %v278_v60, %v277_v56  ;;  %v296_v1 = vrot.slane %v295_v61, 1 }
 0x1ed   :  { %v272_v2 = vadd.f32 %v271_v62, %v270_v58  ;;  %v289_v3 = vrot.slane %v288_v63, 1 }
 0x1ee   :  { %v281_v4 = vmul.f32 0.125, %v279_v0  ;;  %v297_v5 = vadd.f32 %v296_v1, %v295_v61 }
 0x1ef   :  { %v280_v6 = vmul.f32 0.125, %v272_v2  ;;  %v290_v7 = vadd.f32 %v289_v3, %v288_v63 }
 0x1f0   :  { %v299_v8 = vmul.f32 0.125, %v297_v5  ;;  %v301_v9 = vmul.f32 %v281_v4, %v281_v4  ;;  %v305_v18 = vsub.f32 %v262_v37, %v281_v4 }
 0x1f1   :  { %v298_v10 = vmul.f32 0.125, %v290_v7  ;;  %v300_v11 = vmul.f32 %v280_v6, %v280_v6  ;;  %v304_v21 = vsub.f32 %v257_v39, %v280_v6 }
 0x1f2   :  { %v303_v12 = vsub.f32 %v299_v8, %v301_v9 }
 0x1f3   :  { %v302_v13 = vsub.f32 %v298_v10, %v300_v11 }
 0x1f4   :  { %v307_v14 = vadd.f32 1e-05, %v303_v12 }
 0x1f5   :  { %v306_v15 = vadd.f32 1e-05, %v302_v13 }
 0x1f6   :  { %476 = vrsqrt.f32 %v307_v14 }
 0x1f7   :  { %478 = vrsqrt.f32 %v306_v15 }
 0x200   :  { %v477_v20 = vpop.eup %476 }
 0x201   :  { %v479_v22 = vpop.eup %478  ;;  %v311_v23 = vmul.f32 %v477_v20, %v305_v18 }
 0x202   :  { %v310_v25 = vmul.f32 %v479_v22, %v304_v21 }
 0x203   :  { %v317_v26 = vmul.f32 %v315_v19, %v311_v23 }
 0x204   :  { %v316_v27 = vmul.f32 %v315_v19, %v310_v25 }
 0x205   :  { %v323_v28 = vadd.f32 %v321_v24, %v317_v26 }
 0x206   :  { %v322_v30 = vadd.f32 %v321_v24, %v316_v27 }
 0x207   :  { %v325_v31 = vmax.f32 %v323_v28, 0.0 }
 0x208   :  { %v324_v32 = vmax.f32 %v322_v30, 0.0 }
 0x209   :  { %v338_v34 = vmul.f32 %v336_v29, %v325_v31 }
 0x20a   :  { %v330_v38 = vmul.f32 %v590_v36, %v324_v32 }
 0x20b   :  { %v339_v37 = vsel %vm265_vm1, %v338_v34, 0.0 }
 0x20c   :  { %340 = vadd.xlane.f32.xlu1 %v339_v37  ;;  %v331_v39 = vsel %vm265_vm1, %v330_v38, 0.0 }
 0x20d   :  { %332 = vadd.xlane.f32.xlu0 %v331_v39 }
 0x299   :  { %v341_v41 = vpop.xlane.xlu1 %340 }
 0x29a   :  { %v333_v43 = vpop.xlane.xlu0 %332 }
 0x29b   :  { %v342_v44 = vadd.f32 %v341_v41, %v333_v43 }
 0x29d   :  { %v347_v45 = vadd.f32 %v346_v42, %v342_v44 }
 0x29f   :  { %v348_v46 = vsub.f32 0.0, %v347_v45 }
 0x2a1   :  { %v349_v47 = vmul.f32 1.442695, %v348_v46 }
 0x2a3   :  { %480 = vpow2.f32 %v349_v47 }
 0x2ad   :  { %v481_v48 = vpop.eup %480 }
 0x2ae   :  { %v351_v49 = vadd.f32 1.0, %v481_v48 }
 0x2b0   :  { %482 = vrcp.f32 %v351_v49 }
 0x2ba   :  { %v483_v36 = vpop.eup %482 }
 0x2bb   :  { %354 = vst.msk [vmem:[%s622_s5] sm:$0xff] %vm353_vm2, %v483_v36 }

</bundles_post_ra>
